<compile_context>
chip_gen: v7x
topology: tpu7x:2x2x1
jax: 0.10.0
libtpu: 0.0.40
codegen_flags: <defaults>
</compile_context>

<pallas_src>
import functools

import jax
import jax.numpy as jnp
from jax.experimental import pallas as pl
from jax.experimental.pallas import tpu as pltpu


_MiB = 1024 * 1024
# itemsize -> sublane packing (rows per vreg sublane group)
_SUBLANE_PACK = {1: 32, 2: 16, 4: 8, 8: 8}


def _round_up(v, m):
    return -(-v // m) * m


@functools.lru_cache(maxsize=None)
def _hw_config():
    """(tile_target_bytes, vmem_limit_bytes) tuned per TPU generation."""
    try:
        vmem_cap = int(pltpu.get_tpu_info().vmem_capacity_bytes)
    except Exception:
        return 4 * _MiB, 32 * _MiB          # conservative default (works everywhere)
    if vmem_cap >= 96 * _MiB:               # v5e / v6e: 128 MiB physical VMEM
        return 8 * _MiB, 64 * _MiB
    return 6 * _MiB, 32 * _MiB              # v7x: 64 MiB physical VMEM


def _tile_rows(n_rows, row_bytes, itemsize, tile_target):
    """Row-tile size: sublane-packed, VMEM-budgeted, and >=2 grid steps when possible."""
    pack = _SUBLANE_PACK.get(int(itemsize), 8)
    n_rows = int(n_rows)
    if n_rows <= pack:
        return n_rows                       # equals the full dim -> always legal
    cap = max(pack, (int(tile_target) // max(int(row_bytes), 1)) // pack * pack)
    # Cap at ~half the rows so the 'parallel' grid axis has >=2 steps (v7x megacore).
    half = _round_up(-(-n_rows // 2), pack)
    return max(pack, min(cap, half))


# ----------------------------- kernels -------------------------------------


def _mul0_2d_kernel(x_ref, o_ref):
    # out = x * 0 in the input dtype (faithful to .mul(0.0): NaN/Inf -> NaN, -x -> -0.0).
    o_ref[...] = x_ref[...] * jnp.zeros((), o_ref.dtype)


def _mul0_strided_kernel(x_ref, o_ref, *, stride, H_out, W_out):
    # out = x[:, ::s, ::s] * 0 ; strided slice done in-kernel (single fused pass).
    x = x_ref[...]
    xs = x[:, : (H_out - 1) * stride + 1 : stride, : (W_out - 1) * stride + 1 : stride]
    o_ref[...] = xs * jnp.zeros((), o_ref.dtype)


def _zeros_kernel(o_ref):
    # Pure output kernel: C_in != C_out branch has no data dependence on x.
    o_ref[...] = jnp.zeros(o_ref.shape, o_ref.dtype)


# ----------------------------- wrapper --------------------------------------


def zeroize_forward(x, C_in, C_out, stride):
    """Equivalent of Zeroize(C_in, C_out, stride).forward(x) for NCHW input."""
    N, C, H, W = x.shape
    assert C == C_in, f"expected {C_in} input channels, got {C}"
    dtype = x.dtype
    itemsize = jnp.dtype(dtype).itemsize
    tile_target, vmem_limit = _hw_config()
    cparams = pltpu.CompilerParams(
        dimension_semantics=("parallel",),
        vmem_limit_bytes=vmem_limit,
    )

    if C_in == C_out:
        if stride == 1:
            # Lane-dense 2-D view (free, contiguous reshape): rows = N*C, lanes = H*W.
            rows, cols = N * C, H * W
            x2 = x.reshape(rows, cols)
            tile = _tile_rows(rows, cols * itemsize, itemsize, tile_target)
            out = pl.pallas_call(
                _mul0_2d_kernel,
                out_shape=jax.ShapeDtypeStruct((rows, cols), dtype),
                grid=(pl.cdiv(rows, tile),),
                in_specs=[pl.BlockSpec((tile, cols), lambda i: (i, 0))],
                out_specs=pl.BlockSpec((tile, cols), lambda i: (i, 0)),
                compiler_params=cparams,
                cost_estimate=pl.CostEstimate(
                    flops=rows * cols,
                    transcendentals=0,
                    bytes_accessed=2 * rows * cols * itemsize,
                ),
            )(x2)
            return out.reshape(N, C, H, W)

        # Strided spatial subsample, then multiply by zero.
        s = int(stride)
        H_out = -(-H // s)  # ceil(H / s), matches x[:, :, ::s, ::s]
        W_out = -(-W // s)
        rows = N * C
        x3 = x.reshape(rows, H, W)
        tile = _tile_rows(rows, H * W * itemsize, itemsize, tile_target)
        kernel = functools.partial(
            _mul0_strided_kernel, stride=s, H_out=H_out, W_out=W_out
        )
        # TODO(synk): a sublane-strided manual DMA (read only every s-th H row) plus a
        # lane-dense (rows, H_out*W_out) output would cut HBM reads by ~s x; the simpler
        # full-tile read + full-dim output block is kept here for guaranteed lowering
        # while preserving exact mul(0.0) semantics.
        out = pl.pallas_call(
            kernel,
            out_shape=jax.ShapeDtypeStruct((rows, H_out, W_out), dtype),
            grid=(pl.cdiv(rows, tile),),
            # last two dims are the full array dims -> (8,128) rule satisfied.
            in_specs=[pl.BlockSpec((tile, H, W), lambda i: (i, 0, 0))],
            out_specs=pl.BlockSpec((tile, H_out, W_out), lambda i: (i, 0, 0)),
            compiler_params=cparams,
            cost_estimate=pl.CostEstimate(
                flops=rows * H_out * W_out,
                transcendentals=0,
                bytes_accessed=rows * (H * W + H_out * W_out) * itemsize,
            ),
        )(x3)
        return out.reshape(N, C, H_out, W_out)

    # C_in != C_out: plain zeros of the new channel count (stride ignored, as in PyTorch).
    # This branch has no data dependence, so it is a pure (write-only) fill kernel.
    # (If fusion into downstream consumers is preferred over a custom kernel,
    #  `jnp.zeros((N, C_out, H, W), dtype)` is semantically identical here.)
    rows, cols = N * C_out, H * W
    tile = _tile_rows(rows, cols * itemsize, itemsize, tile_target)

    def _build(pipeline_mode):
        if pipeline_mode is None:
            out_spec = pl.BlockSpec((tile, cols), lambda i: (i, 0))
        else:
            out_spec = pl.BlockSpec(
                (tile, cols), lambda i: (i, 0), pipeline_mode=pipeline_mode
            )
        return pl.pallas_call(
            _zeros_kernel,
            out_shape=jax.ShapeDtypeStruct((rows, cols), dtype),
            grid=(pl.cdiv(rows, tile),),
            in_specs=[],
            out_specs=out_spec,
            compiler_params=cparams,
            cost_estimate=pl.CostEstimate(
                flops=0,
                transcendentals=0,
                bytes_accessed=rows * cols * itemsize,
            ),
        )

    try:
        # Compute is nil, so keep more writebacks in flight with 3-deep buffering.
        out = _build(pl.Buffered(3))()
    except Exception:
        out = _build(None)()
    return out.reshape(N, C_out, H, W)


# ----------------------------- test harness ---------------------------------

if __name__ == "__main__":
    key = jax.random.PRNGKey(0)
    x = jax.random.normal(key, (2, 4, 16, 16), dtype=jnp.float32)

    # Branch 1: C_in == C_out, stride == 1  ->  x * 0
    y1 = zeroize_forward(x, C_in=4, C_out=4, stride=1)
    jax.block_until_ready(y1)
    assert y1.shape == (2, 4, 16, 16), y1.shape
    assert jnp.all(y1 == 0.0)

    # Faithfulness check: x.mul(0.0) propagates NaN (unlike a plain zero fill).
    x_nan = x.at[0, 0, 0, 0].set(jnp.nan)
    y1n = zeroize_forward(x_nan, C_in=4, C_out=4, stride=1)
    jax.block_until_ready(y1n)
    assert bool(jnp.isnan(y1n[0, 0, 0, 0]))
    assert int(jnp.isnan(y1n).sum()) == 1

    # Branch 2: C_in == C_out, stride == 2  ->  x[:, :, ::2, ::2] * 0
    y2 = zeroize_forward(x, C_in=4, C_out=4, stride=2)
    jax.block_until_ready(y2)
    assert y2.shape == (2, 4, 8, 8), y2.shape
    assert jnp.all(y2 == 0.0)

    # Branch 3: C_in != C_out  ->  zeros with C_out channels (spatial unchanged)
    y3 = zeroize_forward(x, C_in=4, C_out=8, stride=2)
    jax.block_until_ready(y3)
    assert y3.shape == (2, 8, 16, 16), y3.shape
    assert jnp.all(y3 == 0.0)

    print("KERNEL_OK")
</pallas_src>

<mosaic_0001>
module attributes {stable_mosaic.version = 11 : i64} {
  func.func @_mul0_2d_kernel(%arg0: i32, %arg1: memref<8x256xf32, #tpu.memory_space<vmem>>, %arg2: memref<8x256xf32, #tpu.memory_space<vmem>>) attributes {dimension_semantics = [#tpu.dimension_semantics<parallel>], iteration_bounds = array<i64: 1>, scalar_prefetch = 0 : i64, scratch_operands = 0 : i64, tpu.core_type = #tpu.core_type<tc>, window_params = [{transform_indices = @transform_0, window_bounds = array<i64: 8, 256>}, {transform_indices = @transform_1, window_bounds = array<i64: 8, 256>}]} {
    %c0 = arith.constant 0 : index
    %c0_0 = arith.constant 0 : index
    %0 = vector.load %arg1[%c0, %c0_0] : memref<8x256xf32, #tpu.memory_space<vmem>>, vector<8x256xf32>
    %cst = arith.constant 0.000000e+00 : f32
    %1 = vector.broadcast %cst : f32 to vector<8x256xf32>
    %2 = arith.mulf %0, %1 : vector<8x256xf32>
    %c0_1 = arith.constant 0 : index
    %c0_2 = arith.constant 0 : index
    %3 = vector.load %arg2[%c0_1, %c0_2] : memref<8x256xf32, #tpu.memory_space<vmem>>, vector<8x256xf32>
    tpu.vector_store %arg2[%c0_1, %c0_2], %2 {strides = array<i32>} : memref<8x256xf32, #tpu.memory_space<vmem>>, vector<8x256xf32>,
    return
  }
  func.func @transform_0(%arg0: i32) -> (i32, i32) {
    %c0_i32 = arith.constant 0 : i32
    %c0_i32_0 = arith.constant 0 : i32
    return %arg0, %c0_i32 : i32, i32
  }
  func.func @transform_1(%arg0: i32) -> (i32, i32) {
    %c0_i32 = arith.constant 0 : i32
    %c0_i32_0 = arith.constant 0 : i32
    return %arg0, %c0_i32 : i32, i32
  }
}

</mosaic_0001>

<bundles_post_ra>
// kernel: tpu_custom_call.1
= control target key start
LH: loop header
LB: loop body
LE: loop exit
PB: predicated region body
PF: predicated region fallthrough
CT: control target
= control target key end

     0   :  { %6 = vsyncpa [#allocation3], 0  ;;  %s128_s0 = inlined_call_operand.hbm [shape: f32[8,256], index: 0, kind: input, shape index: {}]   ;;  %s129_s1 = inlined_call_operand.hbm [shape: f32[8,256], index: 1, kind: output, shape index: {}]  }
   0x1   :  { %7 = vsyncpa [#allocation4], 0  ;;  %s92_s6 = smov [#allocation2]   ;;  %s44_s10 = scalar_lea.hbm %s128_s0, 256 }
   0x2   :  { %s14_s7 = sshll.u32 %s92_s6, 4  ;;  %p45_p0 = scmp.ne.s32.totalorder %s128_s0, %s44_s10  ;;  %s15_s7 = int_to_ptr.vmem [resolvable:$true] %s14_s7 }
   0x3   :  { %p48_p1 = scmp.lt.u32.totalorder %s44_s10, %s128_s0 }
   0x5   :  { %p50_p2 = pnand %p48_p1, %p45_p0 }
   0x7   :  { %53 = shalt.err (!%p50_p2)
}
   0x8   :  { %s54_s15 = scalar_lea.vmem %s15_s7, 256  ;;  %p59_p4 = scmp.lt.s32.totalorder %s15_s7, %s15_s7 }
   0x9   :  { %p55_p3 = scmp.ne.s32.totalorder %s15_s7, %s54_s15  ;;  %p60_p5 = scmp.lt.s32.totalorder %s54_s15, %s54_s15 }
   0xb   :  { %p61_p6 = por %p60_p5, %p59_p4 }
   0xd   :  { %p62_p7 = pnand %p61_p6, %p55_p3 }
   0xf   :  { %65 = shalt.err (!%p62_p7)
}
  0x10   :  { %17 = dma.hbm_to_vmem [thread:$0]  %s128_s0, 256, %s15_s7, [#allocation3]  }
  0x11   :  { %88 = dma.done.wait [#allocation3], 256  }
  0x12   :  { %89 = vsyncadd [#allocation3], 4294967040  ;;  %s93_s18 = smov [#allocation5]   ;;  %v21_v0 = vld [vmem:[#allocation2] sm:$0xff]  ;;  %v22_v1 = vld [vmem:[#allocation2 + $0x8] sm:$0xff] }
  0x13   :  { %s33_s19 = sshll.u32 %s93_s18, 4  ;;  %v23_v2 = vmul.f32 0.0, %v21_v0  ;;  %v24_v3 = vmul.f32 0.0, %v22_v1  ;;  %s34_s19 = int_to_ptr.vmem [resolvable:$true] %s33_s19 }
  0x14   :  { %s66_s20 = scalar_lea.vmem %s34_s19, 256  ;;  %p71_p9 = scmp.lt.s32.totalorder %s34_s19, %s34_s19 }
  0x15   :  { %25 = vst [vmem:[#allocation5] sm:$0xff] %v23_v2  ;;  %26 = vst [vmem:[#allocation5 + $0x8] sm:$0xff] %v24_v3  ;;  %p67_p8 = scmp.ne.s32.totalorder %s34_s19, %s66_s20  ;;  %p72_p10 = scmp.lt.s32.totalorder %s66_s20, %s66_s20 }
  0x17   :  { %p73_p11 = por %p72_p10, %p71_p9 }
  0x19   :  { %p74_p12 = pnand %p73_p11, %p67_p8 }
  0x1b   :  { %77 = shalt.err (!%p74_p12)
}
  0x1c   :  { %s78_s22 = scalar_lea.hbm %s129_s1, 256 }
  0x1d   :  { %p79_p13 = scmp.ne.s32.totalorder %s129_s1, %s78_s22  ;;  %p82_p0 = scmp.lt.u32.totalorder %s78_s22, %s129_s1 }
  0x1f   :  { %p84_p1 = pnand %p82_p0, %p79_p13 }
  0x21   :  { %87 = shalt.err (!%p84_p1)
}
  0x22   :  { %36 = dma.vmem_to_hbm [thread:$0]  %s34_s19, 256, %s129_s1, [#allocation4]  }
  0x23   :  { %90 = dma.done.wait [#allocation4], 256  }
  0x24   :  { %91 = vsyncadd [#allocation4], 4294967040 }
  0x25   :  { %40 = vsyncpa [#allocation3], 1 }
  0x26   :  { %41 = vsyncpa [#allocation4], 1 }

</bundles_post_ra>
